<compile_context>
chip_gen: v6e
topology: v6e:2x2x1
jax: 0.10.0
libtpu: 0.0.40
codegen_flags: <defaults>
</compile_context>

<pallas_src>
import jax
import jax.numpy as jnp
from jax.experimental import pallas as pl
from jax.experimental.pallas import tpu as pltpu

LANE = 128
SUBLANE = 8
MXU_M = 256          # M-tile alignment target (v6e/v7x 256x256 MXU; fine on v5e)


def _round_up(x, m):
    return (x + m - 1) // m * m


def _vmem_capacity_bytes():
    """Per-core physical VMEM; falls back to the smallest generation (v7x)."""
    try:
        return int(pltpu.get_tpu_info().vmem_capacity_bytes)
    except Exception:
        return 64 << 20


def fused_mlp_kernel(x_ref, w1_ref, b1_ref, w2_ref, b2_ref, o_ref):
    """One batch tile of: relu(x @ W1 + b1) @ W2 + b2.

    x_ref : (TB, Dp) f32      w1_ref: (Dp, Hp) bf16   b1_ref: (1, Hp) f32
    w2_ref: (Hp, Op) bf16     b2_ref: (1, Op) f32     o_ref : (TB, Op) f32

    Weights were pre-transposed/padded at init, so both dots are plain
    lhs-dim-1 x rhs-dim-0 contractions (no transposed RHS for the MXU).
    bf16 operands feed the MXU at its native rate; bias + ReLU and the
    accumulation stay in f32 on the VPU.
    """
    x = x_ref[...].astype(jnp.bfloat16)
    h = jnp.dot(x, w1_ref[...], preferred_element_type=jnp.float32)
    h = jnp.maximum(h + b1_ref[...], 0.0)                     # f32 bias + ReLU
    out = jnp.dot(h.astype(jnp.bfloat16), w2_ref[...],
                  preferred_element_type=jnp.float32)
    o_ref[...] = (out + b2_ref[...]).astype(o_ref.dtype)


def prepare_mlp_params(w1, b1, w2, b2, *, weight_dtype=jnp.bfloat16,
                       bias_dtype=jnp.float32):
    """One-time (init-time) prep of PyTorch-layout params.

    w1:(H,D) b1:(H,) w2:(O,H) b2:(O,)  ->  transposed + zero-padded to
    128-lane multiples, weights in bf16, biases in f32.  No per-call
    transpose or reshuffle is needed afterwards."""
    H, D = w1.shape
    O = w2.shape[0]
    Dp, Hp, Op = _round_up(D, LANE), _round_up(H, LANE), _round_up(O, LANE)
    w1t = jnp.zeros((Dp, Hp), weight_dtype).at[:D, :H].set(
        w1.T.astype(weight_dtype))
    b1p = jnp.zeros((1, Hp), bias_dtype).at[0, :H].set(b1.astype(bias_dtype))
    w2t = jnp.zeros((Hp, Op), weight_dtype).at[:H, :O].set(
        w2.T.astype(weight_dtype))
    b2p = jnp.zeros((1, Op), bias_dtype).at[0, :O].set(b2.astype(bias_dtype))
    return (w1t, b1p, w2t, b2p), (D, H, O)


def _choose_block_batch(B, per_row_bytes, budget_bytes):
    """MXU-aligned batch tile that fits the VMEM budget."""
    b8 = _round_up(B, SUBLANE)
    max_rows = max(SUBLANE,
                   (budget_bytes // per_row_bytes) // SUBLANE * SUBLANE)
    if b8 <= min(max_rows, 1024):
        return b8                              # single block, grid=(1,)
    if max_rows >= MXU_M:
        return min(1024, (max_rows // MXU_M) * MXU_M)
    return max_rows


def fused_mlp(x, padded_params, logical_dims, *, block_batch=None):
    """x: (B, D) or (B, Dp) float32, features-last like torch.nn.Linear input.

    Returns a lane-padded (B, Op) float32 array; consumers slice [:, :O]
    lazily (keeping outputs lane-dense avoids an extra strided HBM pass and
    keeps downstream Pallas stores unmasked)."""
    w1t, b1p, w2t, b2p = padded_params
    D, H, O = logical_dims
    Dp, Hp = w1t.shape
    Op = w2t.shape[1]
    B, in_dim = x.shape
    assert in_dim in (D, Dp), (in_dim, D, Dp)

    capacity = _vmem_capacity_bytes()
    weight_bytes = (w1t.size * w1t.dtype.itemsize + w2t.size * w2t.dtype.itemsize
                    + b1p.size * b1p.dtype.itemsize + b2p.size * b2p.dtype.itemsize)
    x_item = jnp.dtype(x.dtype).itemsize
    # Per-row VMEM cost: double-buffered x and out tiles (f32), f32 hidden,
    # plus the in-kernel bf16 copies of x and h.
    per_row = 2 * Dp * x_item + 2 * Op * 4 + Hp * 4 + Dp * 2 + Hp * 2
    # Generation-aware budget: half of physical VMEM (32 MiB v7x, 64 MiB
    # v5e/v6e) minus resident (double-buffered) weights and scratch headroom.
    budget = max(per_row * SUBLANE,
                 capacity // 2 - 2 * weight_bytes - (4 << 20))

    if block_batch is None:
        tb = _choose_block_batch(B, per_row, budget)
    else:
        tb = max(SUBLANE, _round_up(block_batch, SUBLANE))
    Bp = _round_up(max(B, tb), tb)

    if in_dim == Dp and Bp == B:
        xp = x                                   # fast path: no extra HBM pass
    else:
        # TODO(synk): produce x already lane-padded / tile-divisible upstream
        # (embedding-concat site) so this pad copy disappears entirely.
        xp = jnp.zeros((Bp, Dp), x.dtype).at[:B, :in_dim].set(x)

    tile_bytes = per_row * tb
    needed = 2 * weight_bytes + tile_bytes + (1 << 20)
    vmem_limit = int(min(capacity // 2, max(4 << 20, 2 * needed)))

    out_p = pl.pallas_call(
        fused_mlp_kernel,
        out_shape=jax.ShapeDtypeStruct((Bp, Op), x.dtype),
        grid_spec=pltpu.PrefetchScalarGridSpec(
            num_scalar_prefetch=0,
            grid=(Bp // tb,),
            in_specs=[
                pl.BlockSpec((tb, Dp), lambda i: (i, 0)),   # x: streamed per tile
                pl.BlockSpec((Dp, Hp), lambda i: (0, 0)),   # weights: VMEM-resident
                pl.BlockSpec((1, Hp), lambda i: (0, 0)),
                pl.BlockSpec((Hp, Op), lambda i: (0, 0)),
                pl.BlockSpec((1, Op), lambda i: (0, 0)),
            ],
            out_specs=pl.BlockSpec((tb, Op), lambda i: (i, 0)),
        ),
        # TODO(synk): on v7x, use CORE_PARALLEL / a tensorcore mesh on the
        # batch axis so multi-tile grids genuinely split across both TCs.
        compiler_params=pltpu.CompilerParams(
            dimension_semantics=("parallel",),
            vmem_limit_bytes=vmem_limit,
        ),
    )(xp, w1t, b1p, w2t, b2p)

    return out_p if Bp == B else out_p[:B]


def init_mlp_params(key, input_dim, output_dim, dtype=jnp.float32):
    """Matches the PyTorch MLP module shapes (hidden = input_dim // 2) with
    nn.Linear's default U(-1/sqrt(fan_in), 1/sqrt(fan_in)) init."""
    hidden = input_dim // 2
    k1, k2, k3, k4 = jax.random.split(key, 4)
    bound1 = 1.0 / (input_dim ** 0.5)
    bound2 = 1.0 / (hidden ** 0.5)
    w1 = jax.random.uniform(k1, (hidden, input_dim), dtype, -bound1, bound1)
    b1 = jax.random.uniform(k2, (hidden,), dtype, -bound1, bound1)
    w2 = jax.random.uniform(k3, (output_dim, hidden), dtype, -bound2, bound2)
    b2 = jax.random.uniform(k4, (output_dim,), dtype, -bound2, bound2)
    return w1, b1, w2, b2


if __name__ == "__main__":
    key = jax.random.PRNGKey(0)
    kx, kp = jax.random.split(key)

    # GraphRec building block: MLP(2*emb_dim -> emb_dim) with emb_dim=64,
    # applied to a flattened (batch * padded_neighbors) stack of concatenated
    # embeddings -> 48 rows of D = 128 features here.  D is already a multiple
    # of 128 and B=48 fits a single MXU-aligned block, so the kernel takes the
    # no-pad / grid=(1,) fast path.
    emb_dim = 64
    batch, input_dim, output_dim = 48, 2 * emb_dim, emb_dim

    x = jax.random.normal(kx, (batch, input_dim), dtype=jnp.float32)
    w1, b1, w2, b2 = init_mlp_params(kp, input_dim, output_dim)

    # One-time weight prep: transpose + lane-pad + bf16 cast (no per-call work).
    padded_params, dims = prepare_mlp_params(w1, b1, w2, b2)

    out_padded = fused_mlp(x, padded_params, dims)          # (48, 128) lane-padded
    out_padded = jax.block_until_ready(out_padded)
    out = out_padded[:, :output_dim]                         # lazy logical slice

    # Reference check in plain JAX (same math as the PyTorch MLP forward).
    # Tolerance loosened for the bf16 matmul operands (f32 accumulation).
    h_ref = jnp.maximum(x @ w1.T + b1, 0.0)
    ref = h_ref @ w2.T + b2
    assert out.shape == (batch, output_dim)
    max_err = float(jnp.max(jnp.abs(out - ref)))
    assert jnp.allclose(out, ref, atol=5e-2, rtol=5e-2), max_err

    print("KERNEL_OK")
</pallas_src>

<mosaic_0001>
module attributes {stable_mosaic.version = 11 : i64} {
  func.func @fused_mlp_kernel(%arg0: i32, %arg1: memref<48x128xf32, #tpu.memory_space<vmem>>, %arg2: memref<128x128xbf16, #tpu.memory_space<vmem>>, %arg3: memref<1x128xf32, #tpu.memory_space<vmem>>, %arg4: memref<128x128xbf16, #tpu.memory_space<vmem>>, %arg5: memref<1x128xf32, #tpu.memory_space<vmem>>, %arg6: memref<48x128xf32, #tpu.memory_space<vmem>>) attributes {dimension_semantics = [#tpu.dimension_semantics<parallel>], iteration_bounds = array<i64: 1>, scalar_prefetch = 0 : i64, scratch_operands = 0 : i64, tpu.core_type = #tpu.core_type<tc>, window_params = [{transform_indices = @transform_0, window_bounds = array<i64: 48, 128>}, {pipeline_mode = #tpu.pipeline_mode<synchronous>, transform_indices = @transform_1, window_bounds = array<i64: 128, 128>}, {pipeline_mode = #tpu.pipeline_mode<synchronous>, transform_indices = @transform_2, window_bounds = array<i64: 1, 128>}, {pipeline_mode = #tpu.pipeline_mode<synchronous>, transform_indices = @transform_3, window_bounds = array<i64: 128, 128>}, {pipeline_mode = #tpu.pipeline_mode<synchronous>, transform_indices = @transform_4, window_bounds = array<i64: 1, 128>}, {transform_indices = @transform_5, window_bounds = array<i64: 48, 128>}]} {
    %c0 = arith.constant 0 : index
    %c0_0 = arith.constant 0 : index
    %0 = vector.load %arg1[%c0, %c0_0] : memref<48x128xf32, #tpu.memory_space<vmem>>, vector<48x128xf32>
    %1 = arith.truncf %0 : vector<48x128xf32> to vector<48x128xbf16>
    %c0_1 = arith.constant 0 : index
    %c0_2 = arith.constant 0 : index
    %2 = vector.load %arg2[%c0_1, %c0_2] : memref<128x128xbf16, #tpu.memory_space<vmem>>, vector<128x128xbf16>
    %cst = arith.constant dense<0.000000e+00> : vector<48x128xf32>
    %3 = tpu.matmul %1, %2, %cst {dimension_numbers = #tpu.dot_dimension_numbers<[1], [0], [0], [1], [0, 0, 1, 1], [], []>} : vector<48x128xbf16>, vector<128x128xbf16>, vector<48x128xf32> -> vector<48x128xf32>
    %c0_3 = arith.constant 0 : index
    %c0_4 = arith.constant 0 : index
    %4 = vector.load %arg3[%c0_3, %c0_4] : memref<1x128xf32, #tpu.memory_space<vmem>>, vector<1x128xf32>
    %5 = vector.broadcast %4 : vector<1x128xf32> to vector<48x128xf32>
    %6 = arith.addf %3, %5 : vector<48x128xf32>
    %cst_5 = arith.constant 0.000000e+00 : f32
    %7 = vector.broadcast %cst_5 : f32 to vector<48x128xf32>
    %8 = arith.maximumf %6, %7 : vector<48x128xf32>
    %9 = arith.truncf %8 : vector<48x128xf32> to vector<48x128xbf16>
    %c0_6 = arith.constant 0 : index
    %c0_7 = arith.constant 0 : index
    %10 = vector.load %arg4[%c0_6, %c0_7] : memref<128x128xbf16, #tpu.memory_space<vmem>>, vector<128x128xbf16>
    %cst_8 = arith.constant dense<0.000000e+00> : vector<48x128xf32>
    %11 = tpu.matmul %9, %10, %cst_8 {dimension_numbers = #tpu.dot_dimension_numbers<[1], [0], [0], [1], [0, 0, 1, 1], [], []>} : vector<48x128xbf16>, vector<128x128xbf16>, vector<48x128xf32> -> vector<48x128xf32>
    %c0_9 = arith.constant 0 : index
    %c0_10 = arith.constant 0 : index
    %12 = vector.load %arg5[%c0_9, %c0_10] : memref<1x128xf32, #tpu.memory_space<vmem>>, vector<1x128xf32>
    %13 = vector.broadcast %12 : vector<1x128xf32> to vector<48x128xf32>
    %14 = arith.addf %11, %13 : vector<48x128xf32>
    %c0_11 = arith.constant 0 : index
    %c0_12 = arith.constant 0 : index
    %15 = vector.load %arg6[%c0_11, %c0_12] : memref<48x128xf32, #tpu.memory_space<vmem>>, vector<48x128xf32>
    tpu.vector_store %arg6[%c0_11, %c0_12], %14 {strides = array<i32>} : memref<48x128xf32, #tpu.memory_space<vmem>>, vector<48x128xf32>,
    return
  }
  func.func @transform_0(%arg0: i32) -> (i32, i32) {
    %c0_i32 = arith.constant 0 : i32
    %c0_i32_0 = arith.constant 0 : i32
    return %arg0, %c0_i32 : i32, i32
  }
  func.func @transform_1(%arg0: i32) -> (i32, i32) {
    %c0_i32 = arith.constant 0 : i32
    %c0_i32_0 = arith.constant 0 : i32
    %c0_i32_1 = arith.constant 0 : i32
    return %c0_i32, %c0_i32_0 : i32, i32
  }
  func.func @transform_2(%arg0: i32) -> (i32, i32) {
    %c0_i32 = arith.constant 0 : i32
    %c0_i32_0 = arith.constant 0 : i32
    %c0_i32_1 = arith.constant 0 : i32
    return %c0_i32, %c0_i32_0 : i32, i32
  }
  func.func @transform_3(%arg0: i32) -> (i32, i32) {
    %c0_i32 = arith.constant 0 : i32
    %c0_i32_0 = arith.constant 0 : i32
    %c0_i32_1 = arith.constant 0 : i32
    return %c0_i32, %c0_i32_0 : i32, i32
  }
  func.func @transform_4(%arg0: i32) -> (i32, i32) {
    %c0_i32 = arith.constant 0 : i32
    %c0_i32_0 = arith.constant 0 : i32
    %c0_i32_1 = arith.constant 0 : i32
    return %c0_i32, %c0_i32_0 : i32, i32
  }
  func.func @transform_5(%arg0: i32) -> (i32, i32) {
    %c0_i32 = arith.constant 0 : i32
    %c0_i32_0 = arith.constant 0 : i32
    return %arg0, %c0_i32 : i32, i32
  }
}

</mosaic_0001>

<bundles_post_ra>
// kernel: tpu_custom_call.1
= control target key start
LH: loop header
LB: loop body
LE: loop exit
PB: predicated region body
PF: predicated region fallthrough
CT: control target
= control target key end

     0   :  { %10 = vsyncpa [#allocation3], 0  ;;  %s661_s0 = inlined_call_operand.hbm [shape: f32[48,128], index: 0, kind: input, shape index: {}]   ;;  %s662_s1 = inlined_call_operand.hbm [shape: bf16[128,128], index: 1, kind: input, shape index: {}]   ;;  %s663_s2 = inlined_call_operand.vmem [shape: f32[1,128], index: 2, kind: input, shape index: {}]   ;;  %s664_s3 = inlined_call_operand.hbm [shape: bf16[128,128], index: 3, kind: input, shape index: {}]   ;;  %s665_s4 = inlined_call_operand.vmem [shape: f32[1,128], index: 4, kind: input, shape index: {}]   ;;  %s666_s5 = inlined_call_operand.hbm [shape: f32[48,128], index: 5, kind: output, shape index: {}]  }
   0x1   :  { %11 = vsyncpa [#allocation6], 0 }
   0x2   :  { %12 = vsyncpa [#allocation4], 0  ;;  %s569_s18 = smov [#allocation5]  }
   0x3   :  { %s30_s19 = sshll.u32 %s569_s18, 4  ;;  %s31_s19 = int_to_ptr.vmem [resolvable:$true] %s30_s19 }
   0x4   :  { %s491_s20 = scalar_lea.vmem %s31_s19, 1024  ;;  %p496_p1 = scmp.lt.s32.totalorder %s31_s19, %s31_s19 }
   0x5   :  { %p492_p0 = scmp.ne.s32.totalorder %s31_s19, %s491_s20  ;;  %p497_p2 = scmp.lt.s32.totalorder %s491_s20, %s491_s20 }
   0x7   :  { %p498_p3 = por %p497_p2, %p496_p1 }
   0x9   :  { %p499_p4 = pnand %p498_p3, %p492_p0 }
   0xb   :  { %502 = shalt.err (!%p499_p4)
}
   0xc   :  { %s570_s21 = smov 64   ;;  %s571_s22 = smov 4  }
   0xd   :  { %36 = dma.hbm_to_vmem [thread:$0]  %s662_s1, 1024, %s31_s19, [#allocation6], %s570_s21, %s570_s21, %s571_s22  }
   0xe   :  { %s572_s25 = smov [#allocation2]  }
   0xf   :  { %s18_s26 = sshll.u32 %s572_s25, 4  ;;  %s19_s26 = int_to_ptr.vmem [resolvable:$true] %s18_s26 }
  0x10   :  { %s511_s27 = scalar_lea.vmem %s19_s26, 768  ;;  %p516_p6 = scmp.lt.s32.totalorder %s19_s26, %s19_s26 }
  0x11   :  { %p512_p5 = scmp.ne.s32.totalorder %s19_s26, %s511_s27  ;;  %p517_p7 = scmp.lt.s32.totalorder %s511_s27, %s511_s27 }
  0x13   :  { %p518_p8 = por %p517_p7, %p516_p6 }
  0x15   :  { %p519_p9 = pnand %p518_p8, %p512_p5 }
  0x17   :  { %522 = shalt.err (!%p519_p9)
}
  0x18   :  { %s573_s28 = smov 128   ;;  %s574_s29 = smov 8  }
  0x19   :  { %24 = dma.hbm_to_vmem [thread:$0]  %s661_s0, 768, %s19_s26, [#allocation3], %s573_s28, %s573_s28, %s574_s29  }
  0x1a   :  { %s575_s1 = smov [#allocation7]  }
  0x1b   :  { %s44_s7 = sshll.u32 %s575_s1, 4  ;;  %s45_s7 = int_to_ptr.vmem [resolvable:$true] %s44_s7 }
  0x1c   :  { %s531_s8 = scalar_lea.vmem %s45_s7, 1024  ;;  %p536_p11 = scmp.lt.s32.totalorder %s45_s7, %s45_s7 }
  0x1d   :  { %p532_p10 = scmp.ne.s32.totalorder %s45_s7, %s531_s8  ;;  %p537_p12 = scmp.lt.s32.totalorder %s531_s8, %s531_s8 }
  0x1f   :  { %p538_p13 = por %p537_p12, %p536_p11 }
  0x21   :  { %p539_p0 = pnand %p538_p13, %p532_p10 }
  0x23   :  { %542 = shalt.err (!%p539_p0)
}
  0x24   :  { %50 = dma.hbm_to_vmem [thread:$0]  %s664_s3, 1024, %s45_s7, [#allocation6], %s570_s21, %s570_s21, %s571_s22  }
  0x25   :  { %563 = dma.done.wait [#allocation3], 768  }
  0x26   :  { %564 = vsyncadd [#allocation3], 4294966528 }
  0x27   :  { %565 = dma.done.wait [#allocation6], 2048  }
  0x28   :  { %566 = vsyncadd [#allocation6], 4294965248  ;;  %v576_v0 = vmov 0.0   ;;  %vm577_vm0 = vmmov 0   ;;  %v467_v1 = vld [vmem:[#allocation5 + $0x38] sm:$0xff]   ;;  %v468_v2 = vld [vmem:[#allocation5 + $0x30] sm:$0xff]  }
  0x29   :  { %401 = vmatprep.subr.bf16.mxu0 %v576_v0  ;;  %417 = vmatprep.mubr.msk.bf16.mxu0 %vm577_vm0, %v576_v0  ;;  %v469_v3 = vld [vmem:[#allocation5 + $0x28] sm:$0xff]   ;;  %v470_v4 = vld [vmem:[#allocation5 + $0x20] sm:$0xff]   ;;  %v475_v5 = vld [vmem:[#allocation7 + $0x38] sm:$0xff]  }
  0x2a   :  { %429 = vmatprep.subr.bf16.mxu1 %v576_v0  ;;  %445 = vmatprep.mubr.msk.bf16.mxu1 %vm577_vm0, %v576_v0  ;;  %v476_v6 = vld [vmem:[#allocation7 + $0x30] sm:$0xff]   ;;  %v471_v7 = vld [vmem:[#allocation5 + $0x18] sm:$0xff]   ;;  %v477_v8 = vld [vmem:[#allocation7 + $0x28] sm:$0xff]  }
  0x2b   :  { %402 = vmatpush3.bf16.msra.mxu0 %v467_v1  ;;  %430 = vmatpush3.bf16.msra.mxu1 %v475_v5  ;;  %v472_v9 = vld [vmem:[#allocation5 + $0x10] sm:$0xff]   ;;  %v478_v10 = vld [vmem:[#allocation7 + $0x20] sm:$0xff]   ;;  %v473_v11 = vld [vmem:[#allocation5 + $0x8] sm:$0xff]  }
  0x2c   :  { %403 = vmatprep.subr.bf16.mxu0 %v576_v0  ;;  %431 = vmatprep.subr.bf16.mxu1 %v576_v0  ;;  %v479_v12 = vld [vmem:[#allocation7 + $0x18] sm:$0xff]   ;;  %v474_v13 = vld [vmem:[#allocation5] sm:$0xff]   ;;  %v63_v14 = vld [vmem:[#allocation2] sm:$0xff] }
  0x2d   :  { %v64_v15 = vld [vmem:[#allocation2 + $0x8] sm:$0xff]  ;;  %v65_v17 = vld [vmem:[#allocation2 + $0x10] sm:$0xff]  ;;  %v66_v18 = vld [vmem:[#allocation2 + $0x18] sm:$0xff] }
  0x2e   :  { %v69_v16 = vpack.c.bf16 %v64_v15, %v63_v14  ;;  %v70_v19 = vpack.c.bf16 %v66_v18, %v65_v17  ;;  %v67_v20 = vld [vmem:[#allocation2 + $0x20] sm:$0xff]  ;;  %v68_v21 = vld [vmem:[#allocation2 + $0x28] sm:$0xff]  ;;  %v481_v24 = vld [vmem:[#allocation7 + $0x8] sm:$0xff]  }
  0x2f   :  { %404 = vmatpush3.bf16.msra.mxu0 %v468_v2  ;;  %432 = vmatpush3.bf16.msra.mxu1 %v476_v6  ;;  %v71_v22 = vpack.c.bf16 %v68_v21, %v67_v20  ;;  %v480_v23 = vld [vmem:[#allocation7 + $0x10] sm:$0xff]   ;;  %v482_v25 = vld [vmem:[#allocation7] sm:$0xff]  }
  0x30   :  { %405 = vmatprep.subr.bf16.mxu0 %v576_v0  ;;  %433 = vmatprep.subr.bf16.mxu1 %v576_v0  ;;  %v361_v26 = vld [vmem:[%s663_s2] ss:$0 sm:$0xff] }
  0x31   :  { %v370_v54 = vld [vmem:[%s665_s4] ss:$0 sm:$0xff]  ;;  %s578_s4 = smov [#allocation8]  }
  0x32   :  { %s348_s12 = sshll.u32 %s578_s4, 4  ;;  %s349_s12 = int_to_ptr.vmem [resolvable:$true] %s348_s12 }
  0x33   :  { %406 = vmatpush3.bf16.msra.mxu0 %v469_v3  ;;  %434 = vmatpush3.bf16.msra.mxu1 %v477_v8  ;;  %s543_s13 = scalar_lea.vmem %s349_s12, 768  ;;  %p548_p2 = scmp.lt.s32.totalorder %s349_s12, %s349_s12 }
  0x34   :  { %407 = vmatprep.subr.bf16.mxu0 %v576_v0  ;;  %435 = vmatprep.subr.bf16.mxu1 %v576_v0  ;;  %p544_p1 = scmp.ne.s32.totalorder %s349_s12, %s543_s13  ;;  %p549_p3 = scmp.lt.s32.totalorder %s543_s13, %s543_s13 }
  0x36   :  { %p550_p4 = por %p549_p3, %p548_p2 }
  0x37   :  { %408 = vmatpush3.bf16.msra.mxu0 %v470_v4  ;;  %436 = vmatpush3.bf16.msra.mxu1 %v478_v10 }
  0x38   :  { %409 = vmatprep.subr.bf16.mxu0 %v576_v0  ;;  %437 = vmatprep.subr.bf16.mxu1 %v576_v0  ;;  %p551_p5 = pnand %p550_p4, %p544_p1 }
  0x3b   :  { %410 = vmatpush3.bf16.msra.mxu0 %v471_v7  ;;  %438 = vmatpush3.bf16.msra.mxu1 %v479_v12 }
  0x3c   :  { %411 = vmatprep.subr.bf16.mxu0 %v576_v0  ;;  %439 = vmatprep.subr.bf16.mxu1 %v576_v0 }
  0x3f   :  { %412 = vmatpush3.bf16.msra.mxu0 %v472_v9  ;;  %440 = vmatpush3.bf16.msra.mxu1 %v480_v23 }
  0x40   :  { %413 = vmatprep.subr.bf16.mxu0 %v576_v0  ;;  %441 = vmatprep.subr.bf16.mxu1 %v576_v0 }
  0x43   :  { %414 = vmatpush3.bf16.msra.mxu0 %v473_v11  ;;  %442 = vmatpush3.bf16.msra.mxu1 %v481_v24 }
  0x44   :  { %415 = vmatprep.subr.bf16.mxu0 %v576_v0  ;;  %443 = vmatprep.subr.bf16.mxu1 %v576_v0 }
  0x47   :  { %416 = vmatpush3.bf16.msra.mxu0 %v474_v13  ;;  %444 = vmatpush3.bf16.msra.mxu1 %v482_v25 }
  0x4a   :  { %418 = vmatmul.mubr.bf16.vlgmr.msra.gmra.mxu0 %v69_v16 }
  0x4b   :  { %421 = vmatprep.mubr.msk.bf16.mxu0 %vm577_vm0, %v576_v0 }
  0x52   :  { %422 = vmatmul.mubr.bf16.gmra.mxu0 %v70_v19 }
  0x53   :  { %425 = vmatprep.mubr.msk.bf16.mxu0 %vm577_vm0, %v576_v0 }
  0x5a   :  { %426 = vmatmul.mubr.bf16.gmra.mxu0 %v71_v22 }
 0x10a   :  { %v177_v27 = vpop.f32.mrf.mxu0 }
 0x10b   :  { %v178_v29 = vadd.f32 %v361_v26, %v177_v27 }
 0x10c   :  { %v419_v28 = vpop.f32.mrf.mxu0 }
 0x10d   :  { %v200_v33 = vmax.f32 %v178_v29, 0.0 }
 0x10e   :  { %v180_v30 = vpop.f32.mrf.mxu0 }
 0x10f   :  { %v181_v31 = vadd.f32 %v361_v26, %v180_v30 }
 0x110   :  { %v420_v32 = vpop.f32.mrf.mxu0 }
 0x111   :  { %v201_v34 = vmax.f32 %v181_v31, 0.0 }
 0x112   :  { %v185_v35 = vpop.f32.mrf.mxu0 }
 0x113   :  { %v206_v36 = vpack.c.bf16 %v201_v34, %v200_v33  ;;  %v186_v38 = vadd.f32 %v361_v26, %v185_v35 }
 0x114   :  { %v423_v37 = vpop.f32.mrf.mxu0 }
 0x115   :  { %446 = vmatmul.mubr.bf16.vlgmr.msra.gmra.mxu1 %v206_v36  ;;  %v202_v42 = vmax.f32 %v186_v38, 0.0 }
 0x116   :  { %v188_v39 = vpop.f32.mrf.mxu0  ;;  %449 = vmatprep.mubr.msk.bf16.mxu1 %vm577_vm0, %v576_v0 }
 0x117   :  { %v189_v40 = vadd.f32 %v361_v26, %v188_v39 }
 0x118   :  { %v424_v41 = vpop.f32.mrf.mxu0 }
 0x119   :  { %v203_v43 = vmax.f32 %v189_v40, 0.0 }
 0x11a   :  { %v193_v44 = vpop.f32.mrf.mxu0 }
 0x11b   :  { %v207_v45 = vpack.c.bf16 %v203_v43, %v202_v42  ;;  %v194_v47 = vadd.f32 %v361_v26, %v193_v44 }
 0x11c   :  { %v427_v46 = vpop.f32.mrf.mxu0 }
 0x11d   :  { %450 = vmatmul.mubr.bf16.gmra.mxu1 %v207_v45  ;;  %v204_v51 = vmax.f32 %v194_v47, 0.0 }
 0x11e   :  { %v196_v48 = vpop.f32.mrf.mxu0  ;;  %453 = vmatprep.mubr.msk.bf16.mxu1 %vm577_vm0, %v576_v0 }
 0x11f   :  { %v197_v49 = vadd.f32 %v361_v26, %v196_v48 }
 0x120   :  { %v428_v50 = vpop.f32.mrf.mxu0 }
 0x121   :  { %v205_v52 = vmax.f32 %v197_v49, 0.0 }
 0x123   :  { %v208_v53 = vpack.c.bf16 %v205_v52, %v204_v51 }
 0x125   :  { %454 = vmatmul.mubr.bf16.gmra.mxu1 %v208_v53 }
 0x1d5   :  { %v314_v55 = vpop.f32.mrf.mxu1 }
 0x1d6   :  { %v315_v56 = vadd.f32 %v370_v54, %v314_v55 }
 0x1d7   :  { %v447_v57 = vpop.f32.mrf.mxu1 }
 0x1d8   :  { %337 = vst [vmem:[#allocation8] sm:$0xff] %v315_v56 }
 0x1d9   :  { %v317_v58 = vpop.f32.mrf.mxu1 }
 0x1da   :  { %v318_v59 = vadd.f32 %v370_v54, %v317_v58 }
 0x1db   :  { %v448_v60 = vpop.f32.mrf.mxu1 }
 0x1dc   :  { %338 = vst [vmem:[#allocation8 + $0x8] sm:$0xff] %v318_v59 }
 0x1dd   :  { %v322_v61 = vpop.f32.mrf.mxu1 }
 0x1de   :  { %v323_v62 = vadd.f32 %v370_v54, %v322_v61 }
 0x1df   :  { %v451_v63 = vpop.f32.mrf.mxu1 }
 0x1e0   :  { %339 = vst [vmem:[#allocation8 + $0x10] sm:$0xff] %v323_v62 }
 0x1e1   :  { %v325_v0 = vpop.f32.mrf.mxu1 }
 0x1e2   :  { %v326_v1 = vadd.f32 %v370_v54, %v325_v0 }
 0x1e3   :  { %v452_v2 = vpop.f32.mrf.mxu1 }
 0x1e4   :  { %340 = vst [vmem:[#allocation8 + $0x18] sm:$0xff] %v326_v1 }
 0x1e5   :  { %v330_v3 = vpop.f32.mrf.mxu1 }
 0x1e6   :  { %v331_v4 = vadd.f32 %v370_v54, %v330_v3 }
 0x1e7   :  { %v455_v5 = vpop.f32.mrf.mxu1 }
 0x1e8   :  { %341 = vst [vmem:[#allocation8 + $0x20] sm:$0xff] %v331_v4 }
 0x1e9   :  { %v333_v6 = vpop.f32.mrf.mxu1 }
 0x1ea   :  { %v334_v7 = vadd.f32 %v370_v54, %v333_v6 }
 0x1eb   :  { %v456_v8 = vpop.f32.mrf.mxu1 }
 0x1ec   :  { %342 = vst [vmem:[#allocation8 + $0x28] sm:$0xff] %v334_v7 }
 0x1ed   :  { %554 = shalt.err (!%p551_p5)
}
 0x1ee   :  { %354 = dma.vmem_to_hbm [thread:$0]  %s349_s12, 768, %s666_s5, [#allocation4], %s573_s28, %s573_s28, %s574_s29  }
 0x1ef   :  { %567 = dma.done.wait [#allocation4], 768  }
 0x1f0   :  { %568 = vsyncadd [#allocation4], 4294966528 }
 0x1f1   :  { %358 = vsyncpa [#allocation3], 1 }
 0x1f2   :  { %359 = vsyncpa [#allocation6], 1 }
 0x1f3   :  { %360 = vsyncpa [#allocation4], 1 }

</bundles_post_ra>
